<compile_context>
chip_gen: v5e
topology: v5e:2x2
jax: 0.10.0
libtpu: 0.0.40
codegen_flags: <defaults>
</compile_context>

<pallas_src>
import functools

import jax
import jax.numpy as jnp
from jax import lax
from jax.experimental import pallas as pl
from jax.experimental.pallas import tpu as pltpu


def _decomp_kernel(*refs, tiled_l):
    if tiled_l:
        x_full_ref, x_tile_ref, w_ref, res_ref, mean_ref = refs
    else:
        x_full_ref, w_ref, res_ref, mean_ref = refs
        x_tile_ref = x_full_ref

    # (rows, L) @ (L, tL) on the (otherwise idle) MXU.  HIGHEST keeps full f32
    # accuracy for the 1/k-weighted band (matches true division to ~1 ulp).
    lhs = x_full_ref[...].astype(jnp.float32)
    mm = jnp.dot(lhs, w_ref[...],
                 precision=lax.Precision.HIGHEST,
                 preferred_element_type=jnp.float32)
    mean_ref[...] = mm.astype(mean_ref.dtype)
    res_ref[...] = (x_tile_ref[...].astype(jnp.float32) - mm).astype(res_ref.dtype)


def _avg_pool_weights(L, kernel_size, dtype=jnp.float32):
    """(L, L) matrix W with W[s, t] = (# window taps of output t reading input s) / k,
    replicate padding folded in, so that moving_mean = x_2d @ W."""
    pad = (kernel_size - 1) // 2
    if L == 1:
        return jnp.ones((1, 1), dtype)
    s = jnp.arange(L)[:, None]
    t = jnp.arange(L)[None, :]
    counts = (jnp.abs(s - t) <= pad).astype(dtype)                 # interior taps
    tt = jnp.arange(L)
    first = jnp.clip(pad - tt + 1, 0, kernel_size).astype(dtype)   # taps clipped to x[0]
    last = jnp.clip(tt + pad - (L - 1) + 1, 0, kernel_size).astype(dtype)  # clipped to x[L-1]
    counts = counts.at[0, :].set(first)
    counts = counts.at[L - 1, :].set(last)
    return counts / kernel_size                                    # true division by k


def _vmem_capacity_bytes():
    try:
        info = pltpu.get_tpu_info()
        for name in ("vmem_capacity_bytes", "vmem_size_bytes", "vmem_bytes"):
            v = getattr(info, name, None)
            if v:
                return int(v)
    except Exception:
        pass
    return 64 << 20  # conservative default (v7x per-TensorCore VMEM)


def series_decomp(x, kernel_size, *, block_rows=None, block_l=None):
    """x: (B, L, C). Returns (res, moving_mean), both (B, L, C)."""
    B, L, C = x.shape
    if kernel_size % 2 != 1:
        # Even kernel_size changes the output length of the PyTorch module and
        # makes `x - moving_mean` ill-defined; standard usage is odd k.
        raise ValueError("series_decomp kernel assumes an odd kernel_size.")

    isz = jnp.dtype(x.dtype).itemsize
    vmem_cap = _vmem_capacity_bytes()
    # Raw-input block budget; live working set (double-buffered in/out, weight
    # block, f32 temporaries) is ~5-6x this, sized per VMEM generation.
    target_block_bytes = (4 << 20) if vmem_cap >= (96 << 20) else (2 << 20)

    rows = B * C

    # Optional L tiling (tiles weight columns + outputs for very long L).
    if block_l is None:
        block_l = L if L <= 1024 else 512
    block_l = max(1, min(block_l, L))
    if block_l < L:
        block_l = min(L, max(128, (block_l // 128) * 128))  # lane dim multiple of 128
    n_l = pl.cdiv(L, block_l)
    tiled_l = n_l > 1

    # Row (batch*channel) tiling with cdiv — no divisibility requirement.
    if block_rows is None:
        block_rows = max(8, (target_block_bytes // max(1, L * isz)) // 8 * 8)
        if rows >= 16:
            # keep >= 2 row blocks so the "parallel" axis can span both v7x cores
            half = max(8, (pl.cdiv(rows, 2) // 8) * 8)
            block_rows = min(block_rows, half)
    if block_rows >= rows:
        block_rows = rows                       # single full block (any row count OK)
    else:
        block_rows = max(8, (block_rows // 8) * 8)  # sublane dim multiple of 8
    n_r = pl.cdiv(rows, block_rows)

    # Lane-dense 2-D slab: rows = (batch, channel), lanes = time.
    x2d = jnp.transpose(x, (0, 2, 1)).reshape(rows, L)
    w = _avg_pool_weights(L, kernel_size, jnp.float32)

    x_full_spec = pl.BlockSpec((block_rows, L), lambda r, l: (r, 0))
    w_spec = pl.BlockSpec((L, block_l), lambda r, l: (0, l))
    tile_spec = pl.BlockSpec((block_rows, block_l), lambda r, l: (r, l))

    in_specs = [x_full_spec] + ([tile_spec] if tiled_l else []) + [w_spec]
    operands = (x2d, x2d, w) if tiled_l else (x2d, w)
    out_sd = jax.ShapeDtypeStruct((rows, L), x.dtype)

    res2d, mean2d = pl.pallas_call(
        functools.partial(_decomp_kernel, tiled_l=tiled_l),
        out_shape=(out_sd, out_sd),
        grid_spec=pltpu.PrefetchScalarGridSpec(
            num_scalar_prefetch=0,
            grid=(n_r, n_l),
            in_specs=in_specs,
            out_specs=[tile_spec, tile_spec],
        ),
        compiler_params=pltpu.CompilerParams(
            dimension_semantics=("parallel", "arbitrary"),
            vmem_limit_bytes=int(min(vmem_cap, 128 << 20) * 3 // 4),
        ),
    )(*operands)

    res = jnp.transpose(res2d.reshape(B, C, L), (0, 2, 1))
    mean = jnp.transpose(mean2d.reshape(B, C, L), (0, 2, 1))
    return res, mean


def _reference(x, kernel_size):
    # Pure-JAX reference mirroring the PyTorch forward.
    pad = (kernel_size - 1) // 2
    front = jnp.repeat(x[:, :1, :], pad, axis=1)
    end = jnp.repeat(x[:, -1:, :], pad, axis=1)
    xp = jnp.concatenate([front, x, end], axis=1)
    L = x.shape[1]
    windows = jnp.stack([xp[:, j:j + L, :] for j in range(kernel_size)], axis=0)
    mm = jnp.mean(windows, axis=0)
    return x - mm, mm


if __name__ == "__main__":
    configs = [
        (4, 16, 8, 5),    # small deterministic config
        (3, 40, 7, 25),   # ragged row tiling + Autoformer-style kernel_size
    ]
    for (B, L, C, kernel_size) in configs:
        key = jax.random.PRNGKey(0)
        x = jax.random.normal(key, (B, L, C), dtype=jnp.float32)

        res, mm = series_decomp(x, kernel_size)
        res = jax.block_until_ready(res)
        mm = jax.block_until_ready(mm)

        ref_res, ref_mm = _reference(x, kernel_size)
        assert res.shape == (B, L, C) and mm.shape == (B, L, C)
        assert jnp.allclose(mm, ref_mm, atol=1e-5, rtol=1e-5), "moving_mean mismatch"
        assert jnp.allclose(res, ref_res, atol=1e-5, rtol=1e-5), "res mismatch"

    print("KERNEL_OK")
</pallas_src>

<mosaic_0001>
module attributes {stable_mosaic.version = 11 : i64} {
  func.func @_decomp_kernel(%arg0: i32, %arg1: i32, %arg2: memref<16x16xf32, #tpu.memory_space<vmem>>, %arg3: memref<16x16xf32, #tpu.memory_space<vmem>>, %arg4: memref<16x16xf32, #tpu.memory_space<vmem>>, %arg5: memref<16x16xf32, #tpu.memory_space<vmem>>) attributes {dimension_semantics = [#tpu.dimension_semantics<parallel>, #tpu.dimension_semantics<arbitrary>], iteration_bounds = array<i64: 2, 1>, scalar_prefetch = 0 : i64, scratch_operands = 0 : i64, tpu.core_type = #tpu.core_type<tc>, window_params = [{transform_indices = @transform_0, window_bounds = array<i64: 16, 16>}, {transform_indices = @transform_1, window_bounds = array<i64: 16, 16>}, {transform_indices = @transform_2, window_bounds = array<i64: 16, 16>}, {transform_indices = @transform_3, window_bounds = array<i64: 16, 16>}]} {
    %c0 = arith.constant 0 : index
    %c0_0 = arith.constant 0 : index
    %0 = vector.load %arg2[%c0, %c0_0] : memref<16x16xf32, #tpu.memory_space<vmem>>, vector<16x16xf32>
    %c0_1 = arith.constant 0 : index
    %c0_2 = arith.constant 0 : index
    %1 = vector.load %arg3[%c0_1, %c0_2] : memref<16x16xf32, #tpu.memory_space<vmem>>, vector<16x16xf32>
    %cst = arith.constant dense<0.000000e+00> : vector<16x16xf32>
    %2 = tpu.matmul %0, %1, %cst {dimension_numbers = #tpu.dot_dimension_numbers<[1], [0], [0], [1], [0, 0, 1, 1], [], []>, precision = #tpu.contract_precision<fp32>} : vector<16x16xf32>, vector<16x16xf32>, vector<16x16xf32> -> vector<16x16xf32>
    %c0_3 = arith.constant 0 : index
    %c0_4 = arith.constant 0 : index
    %3 = vector.load %arg5[%c0_3, %c0_4] : memref<16x16xf32, #tpu.memory_space<vmem>>, vector<16x16xf32>
    tpu.vector_store %arg5[%c0_3, %c0_4], %2 {strides = array<i32>} : memref<16x16xf32, #tpu.memory_space<vmem>>, vector<16x16xf32>,
    %c0_5 = arith.constant 0 : index
    %c0_6 = arith.constant 0 : index
    %4 = vector.load %arg2[%c0_5, %c0_6] : memref<16x16xf32, #tpu.memory_space<vmem>>, vector<16x16xf32>
    %5 = arith.subf %4, %2 : vector<16x16xf32>
    %c0_7 = arith.constant 0 : index
    %c0_8 = arith.constant 0 : index
    %6 = vector.load %arg4[%c0_7, %c0_8] : memref<16x16xf32, #tpu.memory_space<vmem>>, vector<16x16xf32>
    tpu.vector_store %arg4[%c0_7, %c0_8], %5 {strides = array<i32>} : memref<16x16xf32, #tpu.memory_space<vmem>>, vector<16x16xf32>,
    return
  }
  func.func @transform_0(%arg0: i32, %arg1: i32) -> (i32, i32) {
    %c0_i32 = arith.constant 0 : i32
    %c0_i32_0 = arith.constant 0 : i32
    return %arg0, %c0_i32 : i32, i32
  }
  func.func @transform_1(%arg0: i32, %arg1: i32) -> (i32, i32) {
    %c0_i32 = arith.constant 0 : i32
    %c0_i32_0 = arith.constant 0 : i32
    return %c0_i32, %arg1 : i32, i32
  }
  func.func @transform_2(%arg0: i32, %arg1: i32) -> (i32, i32) {
    %c0_i32 = arith.constant 0 : i32
    return %arg0, %arg1 : i32, i32
  }
  func.func @transform_3(%arg0: i32, %arg1: i32) -> (i32, i32) {
    %c0_i32 = arith.constant 0 : i32
    return %arg0, %arg1 : i32, i32
  }
}

</mosaic_0001>

<bundles_post_ra>
// kernel: tpu_custom_call.1
= control target key start
LH: loop header
LB: loop body
LE: loop exit
PB: predicated region body
PF: predicated region fallthrough
CT: control target
= control target key end

     0   :  { %s662_s12 = smov 0   ;;  %s664_s13 = smov 0   ;;  %s719_s0 = inlined_call_operand.vmem [shape: f32[32,16], index: 0, kind: input, shape index: {}]   ;;  %s720_s1 = inlined_call_operand.vmem [shape: f32[16,16], index: 1, kind: input, shape index: {}]   ;;  %s721_s2 = inlined_call_operand.vmem [shape: f32[32,16], index: 2, kind: output, shape index: {0}]   ;;  %s722_s3 = inlined_call_operand.vmem [shape: f32[32,16], index: 3, kind: output, shape index: {1}]  }
   0x1   :  { %s666_s14 = smov 0  }
   0x2 LB: > { %s26_s15 = sadd.s32 1, %s636_s13  ;;  %p581_p0 = scmp.ge.s32.totalorder %s640_s14, 1  ;;  %s640_s14 = sphi %s666_s14, %s14_s14   ;;  %s636_s13 = sphi %s664_s13, %s724_s13   ;;  %s632_s12 = sphi %s662_s12, %s723_s12  }
   0x3   : > { %p28_p1 = scmp.ge.s32.totalorder %s26_s15, 2  ;;  %p166_p2 = scmp.lt.s32.totalorder %s640_s14, 3 }
   0x5   : > { %s726_s15 = smov (%p28_p1, %s26_s15), 0  ;;  %p167_p3 = pnand %p581_p0, %p166_p2 }
   0x6   : > { %s582_s20 = sshll.u32 (!%p167_p3), %s632_s12, 1 }
   0x7   : > { %170 = sbr.rel (%p167_p3) target bundleno = 187 (0xbb), region = 28  ;;  %p206_p4 = scmp.lt.s32.totalorder (!%p167_p3), %s582_s20, 3 }
   0xc   : > { %v236_v0 = vld [vmem:[%s720_s1 + $0x8] sm:$0xff]  ;;  %v235_v1 = vld [vmem:[%s720_s1] sm:$0xff]  ;;  %s728_s20 = smov (!%p206_p4, %s582_s20), 3  ;;  %vm237_vm0 = vcmask 130048  }
   0xd   : > { %v258_v2 = vand.u32 4294901760, %v236_v0  ;;  %v260_v3 = vand.u32 4294901760, %v235_v1  ;;  %s686_s21 = sshll.u32 %s728_s20, 3 }
   0xe   : > { %s209_s24 = scalar_lea.vmem %s719_s0, %s686_s21  ;;  %s231_s27 = scalar_lea.vmem %s722_s3, %s686_s21 }
   0xf   : > { %590 = vmatpush.msra.mxu2 %v258_v2  ;;  %v294_v4 = vsub.f32 %v236_v0, %v258_v2  ;;  %v300_v5 = vsub.f32 %v235_v1, %v260_v3  ;;  %259 = vmatpush.msra.mxu0 %v258_v2  ;;  %v692_v10 = vld [vmem:[%s209_s24 + $0x8] sm:$0xff]  ;;  %v233_v11 = vld [vmem:[%s209_s24] sm:$0xff]  ;;  %s222_s30 = scalar_lea.vmem %s721_s2, %s686_s21 }
  0x10   : > { %v242_v12 = vsel %vm237_vm0, %v692_v10, 0  ;;  %v239_v13 = vsel %vm237_vm0, %v233_v11, 0 }
  0x11   : > { %v295_v6 = vand.u32 4294901760, %v294_v4  ;;  %591 = vmatpush.msra.mxu2 %v260_v3  ;;  %v301_v7 = vand.u32 4294901760, %v300_v5  ;;  %261 = vmatpush.msra.mxu0 %v260_v3  ;;  %v270_v16 = vand.u32 4294901760, %v242_v12  ;;  %v262_v17 = vand.u32 4294901760, %v239_v13 }
  0x13   : > { %330 = vmatpush.msrb.mxu2 %v294_v4  ;;  %v296_v8 = vsub.f32 %v294_v4, %v295_v6  ;;  %v302_v9 = vsub.f32 %v300_v5, %v301_v7  ;;  %393 = vmatpush.msrb.mxu0 %v295_v6  ;;  %v271_v18 = vsub.f32 %v242_v12, %v270_v16 }
  0x14   : > { %v263_v19 = vsub.f32 %v239_v13, %v262_v17 }
  0x15   : > { %333 = vmatpush.msrb.mxu2 %v300_v5  ;;  %v297_v14 = vand.u32 4294901760, %v296_v8  ;;  %v303_v15 = vand.u32 4294901760, %v302_v9  ;;  %397 = vmatpush.msrb.mxu0 %v301_v7  ;;  %v272_v20 = vand.u32 4294901760, %v271_v18 }
  0x16   : > { %v264_v21 = vand.u32 4294901760, %v263_v19 }
  0x17   : > { %592 = vmatpush.msra.mxu3 %v297_v14  ;;  %298 = vmatpush.msra.mxu1 %v297_v14  ;;  %v273_v22 = vsub.f32 %v271_v18, %v272_v20 }
  0x18   : > { %v265_v23 = vsub.f32 %v263_v19, %v264_v21 }
  0x19   : > { %593 = vmatpush.msra.mxu3 %v303_v15  ;;  %304 = vmatpush.msra.mxu1 %v303_v15  ;;  %v274_v24 = vand.u32 4294901760, %v273_v22 }
  0x1a   : > { %310 = vmatmul.f32.vlgmr.msra.gmra.mxu3 %v270_v16  ;;  %306 = vmatmul.f32.vlgmr.msra.gmra.mxu1 %v262_v17  ;;  %v266_v25 = vand.u32 4294901760, %v265_v23 }
  0x1b   : > { %360 = vmatpush.msrb.mxu3 %v258_v2  ;;  %422 = vmatpush.msrb.mxu1 %v258_v2 }
  0x1c   : > { %275 = vmatmul.f32.vlgmr.msra.gmra.mxu2 %v274_v24  ;;  %267 = vmatmul.f32.vlgmr.msra.gmra.mxu0 %v266_v25 }
  0x1d   : > { %362 = vmatpush.msrb.mxu3 %v260_v3  ;;  %424 = vmatpush.msrb.mxu1 %v260_v3 }
  0x22   : > { %366 = vmatmul.f32.vlgmr.msrb.gmra.mxu3 %v264_v21  ;;  %426 = vmatmul.f32.vlgmr.msrb.gmra.mxu1 %v262_v17 }
  0x24   : > { %336 = vmatmul.f32.vlgmr.msrb.gmra.mxu2 %v263_v19  ;;  %399 = vmatmul.f32.vlgmr.msrb.gmra.mxu0 %v262_v17 }
  0x2a   : > { %372 = vmatmul.f32.gmra.mxu3 %v272_v20  ;;  %430 = vmatmul.f32.gmra.mxu1 %v270_v16 }
  0x2c   : > { %341 = vmatmul.f32.gmra.mxu2 %v271_v18  ;;  %403 = vmatmul.f32.gmra.mxu0 %v270_v16 }
  0x97   : > { %v307_v29 = vpop.f32.mrf.mxu1 }
  0x99   : > { %v268_v27 = vpop.f32.mrf.mxu0 }
  0x9a   : > { %v308_v31 = vadd.f32 %v307_v29, %v268_v27 }
  0x9d   : > { %v311_v26 = vpop.f32.mrf.mxu3 }
  0x9f   : > { %v276_v28 = vpop.f32.mrf.mxu2  ;;  %v427_v35 = vpop.f32.mrf.mxu1 }
  0xa0   : > { %v312_v38 = vadd.f32 %v311_v26, %v276_v28 }
  0xa1   : > { %v400_v33 = vpop.f32.mrf.mxu0 }
  0xa5   : > { %v367_v30 = vpop.f32.mrf.mxu3 }
  0xa7   : > { %v337_v32 = vpop.f32.mrf.mxu2  ;;  %v431_v46 = vpop.f32.mrf.mxu1 }
  0xa8   : > { %v338_v34 = vadd.f32 %v337_v32, %v308_v31 }
  0xa9   : > { %v404_v44 = vpop.f32.mrf.mxu0 }
  0xaa   : > { %v368_v36 = vadd.f32 %v367_v30, %v338_v34 }
  0xac   : > { %v401_v37 = vadd.f32 %v400_v33, %v368_v36 }
  0xad   : > { %v373_v41 = vpop.f32.mrf.mxu3 }
  0xae   : > { %v428_v39 = vadd.f32 %v427_v35, %v401_v37 }
  0xaf   : > { %v342_v40 = vpop.f32.mrf.mxu2 }
  0xb0   : > { %434 = vst.msk [vmem:[%s231_s27] sm:$0xff] %vm237_vm0, %v428_v39  ;;  %v438_v42 = vsub.f32 %v233_v11, %v428_v39  ;;  %v343_v43 = vadd.f32 %v342_v40, %v312_v38 }
  0xb2   : > { %440 = vst.msk [vmem:[%s222_s30] sm:$0xff] %vm237_vm0, %v438_v42  ;;  %v374_v45 = vadd.f32 %v373_v41, %v343_v43 }
  0xb4   : > { %v405_v47 = vadd.f32 %v404_v44, %v374_v45 }
  0xb6   : > { %v432_v48 = vadd.f32 %v431_v46, %v405_v47 }
  0xb8   : > { %435 = vst.msk [vmem:[%s231_s27 + $0x8] sm:$0xff] %vm237_vm0, %v432_v48  ;;  %v439_v49 = vsub.f32 %v692_v10, %v432_v48 }
  0xba   : > { %441 = vst.msk [vmem:[%s222_s30 + $0x8] sm:$0xff] %vm237_vm0, %v439_v49 }
  0xbb PF: > { %s14_s14 = sadd.s32 1, %s640_s14   ;;  %s723_s12 = smov %s636_s13 }
  0xbc   : > { %p11_p5 = scmp.ge.s32.totalorder %s14_s14, 4   ;;  %s724_s13 = smov %s726_s15 }
  0xbe   :  { %13 = sbr.rel (!%p11_p5) target bundleno = 2 (0x2), region = 73 }

</bundles_post_ra>
